<compile_context>
chip_gen: v7x
topology: tpu7x:2x2x1
jax: 0.10.0
libtpu: 0.0.40
codegen_flags: <defaults>
</compile_context>

<pallas_src>
import math
import functools

import jax
import jax.numpy as jnp
from jax import lax
from jax.experimental import pallas as pl
from jax.experimental.pallas import tpu as pltpu


def _round_up(x, m):
    return (x + m - 1) // m * m


def _embed_gather_kernel(ids_ref, table_ref, out_ref, sem, *,
                         tile_t, n_chunks, vocab_size, scale, unroll):
    """Gather tile_t embedding rows into the output block and scale by sqrt(d_model).

    ids_ref   : (T_pad,) int32 in SMEM (scalar prefetch) -- flattened token ids
    table_ref : (vocab, d_model) table; resident VMEM block (fast path) or raw
                HBM ref (memory_space=pl.ANY fallback) -- DMA source either way
    out_ref   : (tile_t, d_model) output block in VMEM
    sem       : (n_chunks,) DMA semaphores -- one aggregate wait per chunk
    """
    base = pl.program_id(0) * tile_t
    chunk = tile_t // n_chunks

    def issue_chunk(c):
        start = c * chunk

        def body(j, carry):
            row = jnp.clip(ids_ref[base + start + j], 0, vocab_size - 1)
            pltpu.make_async_copy(
                table_ref.at[pl.ds(row, 1)],        # (1, d_model) source row
                out_ref.at[pl.ds(start + j, 1)],    # (1, d_model) destination row
                sem.at[c],
            ).start()
            return carry

        lax.fori_loop(0, chunk, body, 0, unroll=unroll)

    # Phase 1: issue every row-gather DMA (all chunks in flight at once).
    for c in range(n_chunks):            # small static loop (n_chunks <= 8)
        issue_chunk(c)

    # Phase 2: one aggregate wait per chunk (byte count = whole chunk), then
    # scale that chunk in place.  Scaling chunk c overlaps the still-in-flight
    # DMAs of chunks c+1..n_chunks-1.
    for c in range(n_chunks):
        start = c * chunk
        dst = out_ref.at[pl.ds(start, chunk)]
        pltpu.make_async_copy(dst, dst, sem.at[c]).wait()   # single aggregate wait
        rows = out_ref[pl.ds(start, chunk), :]
        out_ref[pl.ds(start, chunk), :] = (
            rows.astype(jnp.float32) * scale).astype(out_ref.dtype)


# Conservative VMEM budgets (sized against v7x's 64 MiB/core, leaving headroom
# for the double-buffered output block and compiler scratch).
_TABLE_VMEM_BUDGET = 24 * 1024 * 1024
_OUT_BLOCK_BUDGET = 8 * 1024 * 1024


def input_embeddings(x_ids, emb_table, *, tile_t=None, force_hbm_table=False):
    """x_ids: (B, S) int ids, emb_table: (vocab, d_model) -> (B, S, d_model).

    Equivalent to `nn.Embedding(vocab, d_model)(x) * sqrt(d_model)`.
    Output dtype == table dtype (multiply done in f32, cast on store).
    """
    B, S = x_ids.shape
    vocab_size, d_model = emb_table.shape
    T = B * S
    itemsize = jnp.dtype(emb_table.dtype).itemsize
    scale = float(math.sqrt(d_model))

    # Sublane alignment so the (tile_t, d_model) block stays dense.
    align = 8 if itemsize >= 4 else (16 if itemsize == 2 else 32)

    # tile_t: big enough to amortize per-step overhead / keep many gathers in
    # flight, small enough that the double-buffered output block fits VMEM.
    if tile_t is None:
        by_vmem = _OUT_BLOCK_BUDGET // (2 * d_model * itemsize)
        tile_t = min(1024, max(align, by_vmem))
    tile_t = max(align, min(tile_t, _round_up(T, align)))
    tile_t = _round_up(tile_t, align)

    # Pad the token axis to an exact grid (no divisor-hunting, no ragged blocks).
    T_pad = _round_up(T, tile_t)
    grid = T_pad // tile_t

    # Chunking inside a tile for intra-step latency hiding + aggregate waits.
    n_chunks = 1
    for cand in (8, 4, 2):
        if tile_t >= cand * align and tile_t % (cand * align) == 0:
            n_chunks = cand
            break
    chunk = tile_t // n_chunks
    unroll = min(8, chunk)

    # Fast path: pin the whole (pre-fetched-once) table in VMEM and gather with
    # on-chip copies; fall back to per-row HBM DMAs for big vocabularies.
    table_bytes = vocab_size * d_model * itemsize
    out_block_bytes = 2 * tile_t * d_model * itemsize
    resident = (not force_hbm_table) and (
        2 * table_bytes + out_block_bytes <= _TABLE_VMEM_BUDGET)
    if resident:
        table_spec = pl.BlockSpec((vocab_size, d_model), lambda i, ids: (0, 0))
    else:
        table_spec = pl.BlockSpec(memory_space=pl.ANY)

    vmem_need = out_block_bytes + (2 * table_bytes if resident else 0)
    vmem_limit = int(min(56 * 1024 * 1024,
                         max(32 * 1024 * 1024, vmem_need + (4 << 20))))

    ids_flat = x_ids.reshape(T).astype(jnp.int32)
    if T_pad != T:
        ids_flat = jnp.pad(ids_flat, (0, T_pad - T))   # pad ids with a valid index (0)

    # TODO(synk): for very large T (training-scale batches) feed the ids as a
    # tiled SMEM input block instead of scalar-prefetching the whole (T,) array,
    # to stay within SMEM capacity.

    kernel = functools.partial(
        _embed_gather_kernel, tile_t=tile_t, n_chunks=n_chunks,
        vocab_size=vocab_size, scale=scale, unroll=unroll)

    out_flat = pl.pallas_call(
        kernel,
        out_shape=jax.ShapeDtypeStruct((T_pad, d_model), emb_table.dtype),
        grid_spec=pltpu.PrefetchScalarGridSpec(
            num_scalar_prefetch=1,                  # ids -> SMEM scalar indexing
            grid=(grid,),
            in_specs=[table_spec],
            out_specs=pl.BlockSpec((tile_t, d_model), lambda i, ids: (i, 0)),
            scratch_shapes=[pltpu.SemaphoreType.DMA((n_chunks,))],
        ),
        compiler_params=pltpu.CompilerParams(
            dimension_semantics=("parallel",),      # token tiles shard across TCs
            vmem_limit_bytes=vmem_limit),
    )(ids_flat, emb_table)

    out = out_flat[:T] if T_pad != T else out_flat
    return out.reshape(B, S, d_model)


if __name__ == "__main__":
    # Small shapes consistent with the module's forward.
    B, S = 2, 8
    d_model, vocab_size = 128, 64

    key = jax.random.PRNGKey(0)
    k_emb, k_ids = jax.random.split(key)

    # nn.Embedding default init ~ N(0, 1)
    emb_table = jax.random.normal(k_emb, (vocab_size, d_model), dtype=jnp.float32)
    x_ids = jax.random.randint(k_ids, (B, S), 0, vocab_size, dtype=jnp.int32)

    ref = jnp.take(emb_table, x_ids, axis=0) * math.sqrt(d_model)

    # Fast path: table resident in VMEM (default for small tables).
    out = jax.block_until_ready(input_embeddings(x_ids, emb_table))
    assert out.shape == (B, S, d_model)
    assert jnp.allclose(out, ref, atol=1e-5, rtol=1e-5)

    # Fallback path: table left in HBM, per-row DMA gather (big-vocab case).
    out_hbm = jax.block_until_ready(
        input_embeddings(x_ids, emb_table, force_hbm_table=True))
    assert jnp.allclose(out_hbm, ref, atol=1e-5, rtol=1e-5)

    print("KERNEL_OK")
</pallas_src>

<mosaic_0001>
module attributes {stable_mosaic.version = 11 : i64} {
  func.func @_embed_gather_kernel(%arg0: i32, %arg1: memref<16xi32, #tpu.memory_space<smem>>, %arg2: memref<64x128xf32, #tpu.memory_space<vmem>>, %arg3: memref<16x128xf32, #tpu.memory_space<vmem>>, %arg4: memref<2x!tpu.dma_semaphore, #tpu.memory_space<semaphore_mem>>) attributes {dimension_semantics = [#tpu.dimension_semantics<parallel>], iteration_bounds = array<i64: 1>, scalar_prefetch = 1 : i64, scratch_operands = 1 : i64, tpu.core_type = #tpu.core_type<tc>, window_params = [{pipeline_mode = #tpu.pipeline_mode<synchronous>, transform_indices = @transform_0, window_bounds = array<i64: 64, 128>}, {transform_indices = @transform_1, window_bounds = array<i64: 16, 128>}]} {
    %c16_i32 = arith.constant 16 : i32
    %0 = arith.muli %arg0, %c16_i32 : i32
    %c0_i32 = arith.constant 0 : i32
    %c0_i32_0 = arith.constant 0 : i32
    %1 = arith.addi %0, %c0_i32_0 : i32
    %2 = arith.addi %1, %c0_i32 : i32
    %3 = arith.index_cast %2 : i32 to index
    %4 = memref.load %arg1[%3] : memref<16xi32, #tpu.memory_space<smem>>
    %c0_i32_1 = arith.constant 0 : i32
    %c63_i32 = arith.constant 63 : i32
    %5 = arith.maxsi %c0_i32_1, %4 : i32
    %6 = arith.minsi %c63_i32, %5 : i32
    %c0_i32_2 = arith.constant 0 : i32
    %7 = arith.addi %c0_i32_2, %c0_i32 : i32
    %c0_i32_3 = arith.constant 0 : i32
    %c0_i32_4 = arith.constant 0 : i32
    %8 = tpu.memref_slice %arg2[%6, %c0_i32_4] : memref<64x128xf32, #tpu.memory_space<vmem>> -> memref<1x128xf32, #tpu.memory_space<vmem>>
    %c0_i32_5 = arith.constant 0 : i32
    %9 = tpu.memref_slice %arg3[%7, %c0_i32_5] : memref<16x128xf32, #tpu.memory_space<vmem>> -> memref<1x128xf32, #tpu.memory_space<vmem>>
    %10 = tpu.memref_slice %arg4[%c0_i32_3] : memref<2x!tpu.dma_semaphore, #tpu.memory_space<semaphore_mem>> -> memref<1x!tpu.dma_semaphore, #tpu.memory_space<semaphore_mem>>
    %11 = tpu.memref_squeeze %10 : memref<1x!tpu.dma_semaphore, #tpu.memory_space<semaphore_mem>> -> memref<!tpu.dma_semaphore, #tpu.memory_space<semaphore_mem>>
    tpu.enqueue_dma source(%8 : memref<1x128xf32, #tpu.memory_space<vmem>>) target(%9 : memref<1x128xf32, #tpu.memory_space<vmem>>) target_semaphore(%11 : memref<!tpu.dma_semaphore, #tpu.memory_space<semaphore_mem>>)
    %c1_i32 = arith.constant 1 : i32
    %c0_i32_6 = arith.constant 0 : i32
    %12 = arith.addi %0, %c0_i32_6 : i32
    %13 = arith.addi %12, %c1_i32 : i32
    %14 = arith.index_cast %13 : i32 to index
    %15 = memref.load %arg1[%14] : memref<16xi32, #tpu.memory_space<smem>>
    %c0_i32_7 = arith.constant 0 : i32
    %c63_i32_8 = arith.constant 63 : i32
    %16 = arith.maxsi %c0_i32_7, %15 : i32
    %17 = arith.minsi %c63_i32_8, %16 : i32
    %c0_i32_9 = arith.constant 0 : i32
    %18 = arith.addi %c0_i32_9, %c1_i32 : i32
    %c0_i32_10 = arith.constant 0 : i32
    %c0_i32_11 = arith.constant 0 : i32
    %19 = tpu.memref_slice %arg2[%17, %c0_i32_11] : memref<64x128xf32, #tpu.memory_space<vmem>> -> memref<1x128xf32, #tpu.memory_space<vmem>>
    %c0_i32_12 = arith.constant 0 : i32
    %20 = tpu.memref_slice %arg3[%18, %c0_i32_12] : memref<16x128xf32, #tpu.memory_space<vmem>> -> memref<1x128xf32, #tpu.memory_space<vmem>>
    %21 = tpu.memref_slice %arg4[%c0_i32_10] : memref<2x!tpu.dma_semaphore, #tpu.memory_space<semaphore_mem>> -> memref<1x!tpu.dma_semaphore, #tpu.memory_space<semaphore_mem>>
    %22 = tpu.memref_squeeze %21 : memref<1x!tpu.dma_semaphore, #tpu.memory_space<semaphore_mem>> -> memref<!tpu.dma_semaphore, #tpu.memory_space<semaphore_mem>>
    tpu.enqueue_dma source(%19 : memref<1x128xf32, #tpu.memory_space<vmem>>) target(%20 : memref<1x128xf32, #tpu.memory_space<vmem>>) target_semaphore(%22 : memref<!tpu.dma_semaphore, #tpu.memory_space<semaphore_mem>>)
    %c2_i32 = arith.constant 2 : i32
    %c0_i32_13 = arith.constant 0 : i32
    %23 = arith.addi %0, %c0_i32_13 : i32
    %24 = arith.addi %23, %c2_i32 : i32
    %25 = arith.index_cast %24 : i32 to index
    %26 = memref.load %arg1[%25] : memref<16xi32, #tpu.memory_space<smem>>
    %c0_i32_14 = arith.constant 0 : i32
    %c63_i32_15 = arith.constant 63 : i32
    %27 = arith.maxsi %c0_i32_14, %26 : i32
    %28 = arith.minsi %c63_i32_15, %27 : i32
    %c0_i32_16 = arith.constant 0 : i32
    %29 = arith.addi %c0_i32_16, %c2_i32 : i32
    %c0_i32_17 = arith.constant 0 : i32
    %c0_i32_18 = arith.constant 0 : i32
    %30 = tpu.memref_slice %arg2[%28, %c0_i32_18] : memref<64x128xf32, #tpu.memory_space<vmem>> -> memref<1x128xf32, #tpu.memory_space<vmem>>
    %c0_i32_19 = arith.constant 0 : i32
    %31 = tpu.memref_slice %arg3[%29, %c0_i32_19] : memref<16x128xf32, #tpu.memory_space<vmem>> -> memref<1x128xf32, #tpu.memory_space<vmem>>
    %32 = tpu.memref_slice %arg4[%c0_i32_17] : memref<2x!tpu.dma_semaphore, #tpu.memory_space<semaphore_mem>> -> memref<1x!tpu.dma_semaphore, #tpu.memory_space<semaphore_mem>>
    %33 = tpu.memref_squeeze %32 : memref<1x!tpu.dma_semaphore, #tpu.memory_space<semaphore_mem>> -> memref<!tpu.dma_semaphore, #tpu.memory_space<semaphore_mem>>
    tpu.enqueue_dma source(%30 : memref<1x128xf32, #tpu.memory_space<vmem>>) target(%31 : memref<1x128xf32, #tpu.memory_space<vmem>>) target_semaphore(%33 : memref<!tpu.dma_semaphore, #tpu.memory_space<semaphore_mem>>)
    %c3_i32 = arith.constant 3 : i32
    %c0_i32_20 = arith.constant 0 : i32
    %34 = arith.addi %0, %c0_i32_20 : i32
    %35 = arith.addi %34, %c3_i32 : i32
    %36 = arith.index_cast %35 : i32 to index
    %37 = memref.load %arg1[%36] : memref<16xi32, #tpu.memory_space<smem>>
    %c0_i32_21 = arith.constant 0 : i32
    %c63_i32_22 = arith.constant 63 : i32
    %38 = arith.maxsi %c0_i32_21, %37 : i32
    %39 = arith.minsi %c63_i32_22, %38 : i32
    %c0_i32_23 = arith.constant 0 : i32
    %40 = arith.addi %c0_i32_23, %c3_i32 : i32
    %c0_i32_24 = arith.constant 0 : i32
    %c0_i32_25 = arith.constant 0 : i32
    %41 = tpu.memref_slice %arg2[%39, %c0_i32_25] : memref<64x128xf32, #tpu.memory_space<vmem>> -> memref<1x128xf32, #tpu.memory_space<vmem>>
    %c0_i32_26 = arith.constant 0 : i32
    %42 = tpu.memref_slice %arg3[%40, %c0_i32_26] : memref<16x128xf32, #tpu.memory_space<vmem>> -> memref<1x128xf32, #tpu.memory_space<vmem>>
    %43 = tpu.memref_slice %arg4[%c0_i32_24] : memref<2x!tpu.dma_semaphore, #tpu.memory_space<semaphore_mem>> -> memref<1x!tpu.dma_semaphore, #tpu.memory_space<semaphore_mem>>
    %44 = tpu.memref_squeeze %43 : memref<1x!tpu.dma_semaphore, #tpu.memory_space<semaphore_mem>> -> memref<!tpu.dma_semaphore, #tpu.memory_space<semaphore_mem>>
    tpu.enqueue_dma source(%41 : memref<1x128xf32, #tpu.memory_space<vmem>>) target(%42 : memref<1x128xf32, #tpu.memory_space<vmem>>) target_semaphore(%44 : memref<!tpu.dma_semaphore, #tpu.memory_space<semaphore_mem>>)
    %c4_i32 = arith.constant 4 : i32
    %c0_i32_27 = arith.constant 0 : i32
    %45 = arith.addi %0, %c0_i32_27 : i32
    %46 = arith.addi %45, %c4_i32 : i32
    %47 = arith.index_cast %46 : i32 to index
    %48 = memref.load %arg1[%47] : memref<16xi32, #tpu.memory_space<smem>>
    %c0_i32_28 = arith.constant 0 : i32
    %c63_i32_29 = arith.constant 63 : i32
    %49 = arith.maxsi %c0_i32_28, %48 : i32
    %50 = arith.minsi %c63_i32_29, %49 : i32
    %c0_i32_30 = arith.constant 0 : i32
    %51 = arith.addi %c0_i32_30, %c4_i32 : i32
    %c0_i32_31 = arith.constant 0 : i32
    %c0_i32_32 = arith.constant 0 : i32
    %52 = tpu.memref_slice %arg2[%50, %c0_i32_32] : memref<64x128xf32, #tpu.memory_space<vmem>> -> memref<1x128xf32, #tpu.memory_space<vmem>>
    %c0_i32_33 = arith.constant 0 : i32
    %53 = tpu.memref_slice %arg3[%51, %c0_i32_33] : memref<16x128xf32, #tpu.memory_space<vmem>> -> memref<1x128xf32, #tpu.memory_space<vmem>>
    %54 = tpu.memref_slice %arg4[%c0_i32_31] : memref<2x!tpu.dma_semaphore, #tpu.memory_space<semaphore_mem>> -> memref<1x!tpu.dma_semaphore, #tpu.memory_space<semaphore_mem>>
    %55 = tpu.memref_squeeze %54 : memref<1x!tpu.dma_semaphore, #tpu.memory_space<semaphore_mem>> -> memref<!tpu.dma_semaphore, #tpu.memory_space<semaphore_mem>>
    tpu.enqueue_dma source(%52 : memref<1x128xf32, #tpu.memory_space<vmem>>) target(%53 : memref<1x128xf32, #tpu.memory_space<vmem>>) target_semaphore(%55 : memref<!tpu.dma_semaphore, #tpu.memory_space<semaphore_mem>>)
    %c5_i32 = arith.constant 5 : i32
    %c0_i32_34 = arith.constant 0 : i32
    %56 = arith.addi %0, %c0_i32_34 : i32
    %57 = arith.addi %56, %c5_i32 : i32
    %58 = arith.index_cast %57 : i32 to index
    %59 = memref.load %arg1[%58] : memref<16xi32, #tpu.memory_space<smem>>
    %c0_i32_35 = arith.constant 0 : i32
    %c63_i32_36 = arith.constant 63 : i32
    %60 = arith.maxsi %c0_i32_35, %59 : i32
    %61 = arith.minsi %c63_i32_36, %60 : i32
    %c0_i32_37 = arith.constant 0 : i32
    %62 = arith.addi %c0_i32_37, %c5_i32 : i32
    %c0_i32_38 = arith.constant 0 : i32
    %c0_i32_39 = arith.constant 0 : i32
    %63 = tpu.memref_slice %arg2[%61, %c0_i32_39] : memref<64x128xf32, #tpu.memory_space<vmem>> -> memref<1x128xf32, #tpu.memory_space<vmem>>
    %c0_i32_40 = arith.constant 0 : i32
    %64 = tpu.memref_slice %arg3[%62, %c0_i32_40] : memref<16x128xf32, #tpu.memory_space<vmem>> -> memref<1x128xf32, #tpu.memory_space<vmem>>
    %65 = tpu.memref_slice %arg4[%c0_i32_38] : memref<2x!tpu.dma_semaphore, #tpu.memory_space<semaphore_mem>> -> memref<1x!tpu.dma_semaphore, #tpu.memory_space<semaphore_mem>>
    %66 = tpu.memref_squeeze %65 : memref<1x!tpu.dma_semaphore, #tpu.memory_space<semaphore_mem>> -> memref<!tpu.dma_semaphore, #tpu.memory_space<semaphore_mem>>
    tpu.enqueue_dma source(%63 : memref<1x128xf32, #tpu.memory_space<vmem>>) target(%64 : memref<1x128xf32, #tpu.memory_space<vmem>>) target_semaphore(%66 : memref<!tpu.dma_semaphore, #tpu.memory_space<semaphore_mem>>)
    %c6_i32 = arith.constant 6 : i32
    %c0_i32_41 = arith.constant 0 : i32
    %67 = arith.addi %0, %c0_i32_41 : i32
    %68 = arith.addi %67, %c6_i32 : i32
    %69 = arith.index_cast %68 : i32 to index
    %70 = memref.load %arg1[%69] : memref<16xi32, #tpu.memory_space<smem>>
    %c0_i32_42 = arith.constant 0 : i32
    %c63_i32_43 = arith.constant 63 : i32
    %71 = arith.maxsi %c0_i32_42, %70 : i32
    %72 = arith.minsi %c63_i32_43, %71 : i32
    %c0_i32_44 = arith.constant 0 : i32
    %73 = arith.addi %c0_i32_44, %c6_i32 : i32
    %c0_i32_45 = arith.constant 0 : i32
    %c0_i32_46 = arith.constant 0 : i32
    %74 = tpu.memref_slice %arg2[%72, %c0_i32_46] : memref<64x128xf32, #tpu.memory_space<vmem>> -> memref<1x128xf32, #tpu.memory_space<vmem>>
    %c0_i32_47 = arith.constant 0 : i32
    %75 = tpu.memref_slice %arg3[%73, %c0_i32_47] : memref<16x128xf32, #tpu.memory_space<vmem>> -> memref<1x128xf32, #tpu.memory_space<vmem>>
    %76 = tpu.memref_slice %arg4[%c0_i32_45] : memref<2x!tpu.dma_semaphore, #tpu.memory_space<semaphore_mem>> -> memref<1x!tpu.dma_semaphore, #tpu.memory_space<semaphore_mem>>
    %77 = tpu.memref_squeeze %76 : memref<1x!tpu.dma_semaphore, #tpu.memory_space<semaphore_mem>> -> memref<!tpu.dma_semaphore, #tpu.memory_space<semaphore_mem>>
    tpu.enqueue_dma source(%74 : memref<1x128xf32, #tpu.memory_space<vmem>>) target(%75 : memref<1x128xf32, #tpu.memory_space<vmem>>) target_semaphore(%77 : memref<!tpu.dma_semaphore, #tpu.memory_space<semaphore_mem>>)
    %c7_i32 = arith.constant 7 : i32
    %c0_i32_48 = arith.constant 0 : i32
    %78 = arith.addi %0, %c0_i32_48 : i32
    %79 = arith.addi %78, %c7_i32 : i32
    %80 = arith.index_cast %79 : i32 to index
    %81 = memref.load %arg1[%80] : memref<16xi32, #tpu.memory_space<smem>>
    %c0_i32_49 = arith.constant 0 : i32
    %c63_i32_50 = arith.constant 63 : i32
    %82 = arith.maxsi %c0_i32_49, %81 : i32
    %83 = arith.minsi %c63_i32_50, %82 : i32
    %c0_i32_51 = arith.constant 0 : i32
    %84 = arith.addi %c0_i32_51, %c7_i32 : i32
    %c0_i32_52 = arith.constant 0 : i32
    %c0_i32_53 = arith.constant 0 : i32
    %85 = tpu.memref_slice %arg2[%83, %c0_i32_53] : memref<64x128xf32, #tpu.memory_space<vmem>> -> memref<1x128xf32, #tpu.memory_space<vmem>>
    %c0_i32_54 = arith.constant 0 : i32
    %86 = tpu.memref_slice %arg3[%84, %c0_i32_54] : memref<16x128xf32, #tpu.memory_space<vmem>> -> memref<1x128xf32, #tpu.memory_space<vmem>>
    %87 = tpu.memref_slice %arg4[%c0_i32_52] : memref<2x!tpu.dma_semaphore, #tpu.memory_space<semaphore_mem>> -> memref<1x!tpu.dma_semaphore, #tpu.memory_space<semaphore_mem>>
    %88 = tpu.memref_squeeze %87 : memref<1x!tpu.dma_semaphore, #tpu.memory_space<semaphore_mem>> -> memref<!tpu.dma_semaphore, #tpu.memory_space<semaphore_mem>>
    tpu.enqueue_dma source(%85 : memref<1x128xf32, #tpu.memory_space<vmem>>) target(%86 : memref<1x128xf32, #tpu.memory_space<vmem>>) target_semaphore(%88 : memref<!tpu.dma_semaphore, #tpu.memory_space<semaphore_mem>>)
    %c8_i32 = arith.constant 8 : i32
    %c0_i32_55 = arith.constant 0 : i32
    %c8_i32_56 = arith.constant 8 : i32
    %89 = arith.addi %0, %c8_i32_56 : i32
    %90 = arith.addi %89, %c0_i32_55 : i32
    %91 = arith.index_cast %90 : i32 to index
    %92 = memref.load %arg1[%91] : memref<16xi32, #tpu.memory_space<smem>>
    %c0_i32_57 = arith.constant 0 : i32
    %c63_i32_58 = arith.constant 63 : i32
    %93 = arith.maxsi %c0_i32_57, %92 : i32
    %94 = arith.minsi %c63_i32_58, %93 : i32
    %c8_i32_59 = arith.constant 8 : i32
    %95 = arith.addi %c8_i32_59, %c0_i32_55 : i32
    %c1_i32_60 = arith.constant 1 : i32
    %c0_i32_61 = arith.constant 0 : i32
    %96 = tpu.memref_slice %arg2[%94, %c0_i32_61] : memref<64x128xf32, #tpu.memory_space<vmem>> -> memref<1x128xf32, #tpu.memory_space<vmem>>
    %c0_i32_62 = arith.constant 0 : i32
    %97 = tpu.memref_slice %arg3[%95, %c0_i32_62] : memref<16x128xf32, #tpu.memory_space<vmem>> -> memref<1x128xf32, #tpu.memory_space<vmem>>
    %98 = tpu.memref_slice %arg4[%c1_i32_60] : memref<2x!tpu.dma_semaphore, #tpu.memory_space<semaphore_mem>> -> memref<1x!tpu.dma_semaphore, #tpu.memory_space<semaphore_mem>>
    %99 = tpu.memref_squeeze %98 : memref<1x!tpu.dma_semaphore, #tpu.memory_space<semaphore_mem>> -> memref<!tpu.dma_semaphore, #tpu.memory_space<semaphore_mem>>
    tpu.enqueue_dma source(%96 : memref<1x128xf32, #tpu.memory_space<vmem>>) target(%97 : memref<1x128xf32, #tpu.memory_space<vmem>>) target_semaphore(%99 : memref<!tpu.dma_semaphore, #tpu.memory_space<semaphore_mem>>)
    %c1_i32_63 = arith.constant 1 : i32
    %c8_i32_64 = arith.constant 8 : i32
    %100 = arith.addi %0, %c8_i32_64 : i32
    %101 = arith.addi %100, %c1_i32_63 : i32
    %102 = arith.index_cast %101 : i32 to index
    %103 = memref.load %arg1[%102] : memref<16xi32, #tpu.memory_space<smem>>
    %c0_i32_65 = arith.constant 0 : i32
    %c63_i32_66 = arith.constant 63 : i32
    %104 = arith.maxsi %c0_i32_65, %103 : i32
    %105 = arith.minsi %c63_i32_66, %104 : i32
    %c8_i32_67 = arith.constant 8 : i32
    %106 = arith.addi %c8_i32_67, %c1_i32_63 : i32
    %c1_i32_68 = arith.constant 1 : i32
    %c0_i32_69 = arith.constant 0 : i32
    %107 = tpu.memref_slice %arg2[%105, %c0_i32_69] : memref<64x128xf32, #tpu.memory_space<vmem>> -> memref<1x128xf32, #tpu.memory_space<vmem>>
    %c0_i32_70 = arith.constant 0 : i32
    %108 = tpu.memref_slice %arg3[%106, %c0_i32_70] : memref<16x128xf32, #tpu.memory_space<vmem>> -> memref<1x128xf32, #tpu.memory_space<vmem>>
    %109 = tpu.memref_slice %arg4[%c1_i32_68] : memref<2x!tpu.dma_semaphore, #tpu.memory_space<semaphore_mem>> -> memref<1x!tpu.dma_semaphore, #tpu.memory_space<semaphore_mem>>
    %110 = tpu.memref_squeeze %109 : memref<1x!tpu.dma_semaphore, #tpu.memory_space<semaphore_mem>> -> memref<!tpu.dma_semaphore, #tpu.memory_space<semaphore_mem>>
    tpu.enqueue_dma source(%107 : memref<1x128xf32, #tpu.memory_space<vmem>>) target(%108 : memref<1x128xf32, #tpu.memory_space<vmem>>) target_semaphore(%110 : memref<!tpu.dma_semaphore, #tpu.memory_space<semaphore_mem>>)
    %c2_i32_71 = arith.constant 2 : i32
    %c8_i32_72 = arith.constant 8 : i32
    %111 = arith.addi %0, %c8_i32_72 : i32
    %112 = arith.addi %111, %c2_i32_71 : i32
    %113 = arith.index_cast %112 : i32 to index
    %114 = memref.load %arg1[%113] : memref<16xi32, #tpu.memory_space<smem>>
    %c0_i32_73 = arith.constant 0 : i32
    %c63_i32_74 = arith.constant 63 : i32
    %115 = arith.maxsi %c0_i32_73, %114 : i32
    %116 = arith.minsi %c63_i32_74, %115 : i32
    %c8_i32_75 = arith.constant 8 : i32
    %117 = arith.addi %c8_i32_75, %c2_i32_71 : i32
    %c1_i32_76 = arith.constant 1 : i32
    %c0_i32_77 = arith.constant 0 : i32
    %118 = tpu.memref_slice %arg2[%116, %c0_i32_77] : memref<64x128xf32, #tpu.memory_space<vmem>> -> memref<1x128xf32, #tpu.memory_space<vmem>>
    %c0_i32_78 = arith.constant 0 : i32
    %119 = tpu.memref_slice %arg3[%117, %c0_i32_78] : memref<16x128xf32, #tpu.memory_space<vmem>> -> memref<1x128xf32, #tpu.memory_space<vmem>>
    %120 = tpu.memref_slice %arg4[%c1_i32_76] : memref<2x!tpu.dma_semaphore, #tpu.memory_space<semaphore_mem>> -> memref<1x!tpu.dma_semaphore, #tpu.memory_space<semaphore_mem>>
    %121 = tpu.memref_squeeze %120 : memref<1x!tpu.dma_semaphore, #tpu.memory_space<semaphore_mem>> -> memref<!tpu.dma_semaphore, #tpu.memory_space<semaphore_mem>>
    tpu.enqueue_dma source(%118 : memref<1x128xf32, #tpu.memory_space<vmem>>) target(%119 : memref<1x128xf32, #tpu.memory_space<vmem>>) target_semaphore(%121 : memref<!tpu.dma_semaphore, #tpu.memory_space<semaphore_mem>>)
    %c3_i32_79 = arith.constant 3 : i32
    %c8_i32_80 = arith.constant 8 : i32
    %122 = arith.addi %0, %c8_i32_80 : i32
    %123 = arith.addi %122, %c3_i32_79 : i32
    %124 = arith.index_cast %123 : i32 to index
    %125 = memref.load %arg1[%124] : memref<16xi32, #tpu.memory_space<smem>>
    %c0_i32_81 = arith.constant 0 : i32
    %c63_i32_82 = arith.constant 63 : i32
    %126 = arith.maxsi %c0_i32_81, %125 : i32
    %127 = arith.minsi %c63_i32_82, %126 : i32
    %c8_i32_83 = arith.constant 8 : i32
    %128 = arith.addi %c8_i32_83, %c3_i32_79 : i32
    %c1_i32_84 = arith.constant 1 : i32
    %c0_i32_85 = arith.constant 0 : i32
    %129 = tpu.memref_slice %arg2[%127, %c0_i32_85] : memref<64x128xf32, #tpu.memory_space<vmem>> -> memref<1x128xf32, #tpu.memory_space<vmem>>
    %c0_i32_86 = arith.constant 0 : i32
    %130 = tpu.memref_slice %arg3[%128, %c0_i32_86] : memref<16x128xf32, #tpu.memory_space<vmem>> -> memref<1x128xf32, #tpu.memory_space<vmem>>
    %131 = tpu.memref_slice %arg4[%c1_i32_84] : memref<2x!tpu.dma_semaphore, #tpu.memory_space<semaphore_mem>> -> memref<1x!tpu.dma_semaphore, #tpu.memory_space<semaphore_mem>>
    %132 = tpu.memref_squeeze %131 : memref<1x!tpu.dma_semaphore, #tpu.memory_space<semaphore_mem>> -> memref<!tpu.dma_semaphore, #tpu.memory_space<semaphore_mem>>
    tpu.enqueue_dma source(%129 : memref<1x128xf32, #tpu.memory_space<vmem>>) target(%130 : memref<1x128xf32, #tpu.memory_space<vmem>>) target_semaphore(%132 : memref<!tpu.dma_semaphore, #tpu.memory_space<semaphore_mem>>)
    %c4_i32_87 = arith.constant 4 : i32
    %c8_i32_88 = arith.constant 8 : i32
    %133 = arith.addi %0, %c8_i32_88 : i32
    %134 = arith.addi %133, %c4_i32_87 : i32
    %135 = arith.index_cast %134 : i32 to index
    %136 = memref.load %arg1[%135] : memref<16xi32, #tpu.memory_space<smem>>
    %c0_i32_89 = arith.constant 0 : i32
    %c63_i32_90 = arith.constant 63 : i32
    %137 = arith.maxsi %c0_i32_89, %136 : i32
    %138 = arith.minsi %c63_i32_90, %137 : i32
    %c8_i32_91 = arith.constant 8 : i32
    %139 = arith.addi %c8_i32_91, %c4_i32_87 : i32
    %c1_i32_92 = arith.constant 1 : i32
    %c0_i32_93 = arith.constant 0 : i32
    %140 = tpu.memref_slice %arg2[%138, %c0_i32_93] : memref<64x128xf32, #tpu.memory_space<vmem>> -> memref<1x128xf32, #tpu.memory_space<vmem>>
    %c0_i32_94 = arith.constant 0 : i32
    %141 = tpu.memref_slice %arg3[%139, %c0_i32_94] : memref<16x128xf32, #tpu.memory_space<vmem>> -> memref<1x128xf32, #tpu.memory_space<vmem>>
    %142 = tpu.memref_slice %arg4[%c1_i32_92] : memref<2x!tpu.dma_semaphore, #tpu.memory_space<semaphore_mem>> -> memref<1x!tpu.dma_semaphore, #tpu.memory_space<semaphore_mem>>
    %143 = tpu.memref_squeeze %142 : memref<1x!tpu.dma_semaphore, #tpu.memory_space<semaphore_mem>> -> memref<!tpu.dma_semaphore, #tpu.memory_space<semaphore_mem>>
    tpu.enqueue_dma source(%140 : memref<1x128xf32, #tpu.memory_space<vmem>>) target(%141 : memref<1x128xf32, #tpu.memory_space<vmem>>) target_semaphore(%143 : memref<!tpu.dma_semaphore, #tpu.memory_space<semaphore_mem>>)
    %c5_i32_95 = arith.constant 5 : i32
    %c8_i32_96 = arith.constant 8 : i32
    %144 = arith.addi %0, %c8_i32_96 : i32
    %145 = arith.addi %144, %c5_i32_95 : i32
    %146 = arith.index_cast %145 : i32 to index
    %147 = memref.load %arg1[%146] : memref<16xi32, #tpu.memory_space<smem>>
    %c0_i32_97 = arith.constant 0 : i32
    %c63_i32_98 = arith.constant 63 : i32
    %148 = arith.maxsi %c0_i32_97, %147 : i32
    %149 = arith.minsi %c63_i32_98, %148 : i32
    %c8_i32_99 = arith.constant 8 : i32
    %150 = arith.addi %c8_i32_99, %c5_i32_95 : i32
    %c1_i32_100 = arith.constant 1 : i32
    %c0_i32_101 = arith.constant 0 : i32
    %151 = tpu.memref_slice %arg2[%149, %c0_i32_101] : memref<64x128xf32, #tpu.memory_space<vmem>> -> memref<1x128xf32, #tpu.memory_space<vmem>>
    %c0_i32_102 = arith.constant 0 : i32
    %152 = tpu.memref_slice %arg3[%150, %c0_i32_102] : memref<16x128xf32, #tpu.memory_space<vmem>> -> memref<1x128xf32, #tpu.memory_space<vmem>>
    %153 = tpu.memref_slice %arg4[%c1_i32_100] : memref<2x!tpu.dma_semaphore, #tpu.memory_space<semaphore_mem>> -> memref<1x!tpu.dma_semaphore, #tpu.memory_space<semaphore_mem>>
    %154 = tpu.memref_squeeze %153 : memref<1x!tpu.dma_semaphore, #tpu.memory_space<semaphore_mem>> -> memref<!tpu.dma_semaphore, #tpu.memory_space<semaphore_mem>>
    tpu.enqueue_dma source(%151 : memref<1x128xf32, #tpu.memory_space<vmem>>) target(%152 : memref<1x128xf32, #tpu.memory_space<vmem>>) target_semaphore(%154 : memref<!tpu.dma_semaphore, #tpu.memory_space<semaphore_mem>>)
    %c6_i32_103 = arith.constant 6 : i32
    %c8_i32_104 = arith.constant 8 : i32
    %155 = arith.addi %0, %c8_i32_104 : i32
    %156 = arith.addi %155, %c6_i32_103 : i32
    %157 = arith.index_cast %156 : i32 to index
    %158 = memref.load %arg1[%157] : memref<16xi32, #tpu.memory_space<smem>>
    %c0_i32_105 = arith.constant 0 : i32
    %c63_i32_106 = arith.constant 63 : i32
    %159 = arith.maxsi %c0_i32_105, %158 : i32
    %160 = arith.minsi %c63_i32_106, %159 : i32
    %c8_i32_107 = arith.constant 8 : i32
    %161 = arith.addi %c8_i32_107, %c6_i32_103 : i32
    %c1_i32_108 = arith.constant 1 : i32
    %c0_i32_109 = arith.constant 0 : i32
    %162 = tpu.memref_slice %arg2[%160, %c0_i32_109] : memref<64x128xf32, #tpu.memory_space<vmem>> -> memref<1x128xf32, #tpu.memory_space<vmem>>
    %c0_i32_110 = arith.constant 0 : i32
    %163 = tpu.memref_slice %arg3[%161, %c0_i32_110] : memref<16x128xf32, #tpu.memory_space<vmem>> -> memref<1x128xf32, #tpu.memory_space<vmem>>
    %164 = tpu.memref_slice %arg4[%c1_i32_108] : memref<2x!tpu.dma_semaphore, #tpu.memory_space<semaphore_mem>> -> memref<1x!tpu.dma_semaphore, #tpu.memory_space<semaphore_mem>>
    %165 = tpu.memref_squeeze %164 : memref<1x!tpu.dma_semaphore, #tpu.memory_space<semaphore_mem>> -> memref<!tpu.dma_semaphore, #tpu.memory_space<semaphore_mem>>
    tpu.enqueue_dma source(%162 : memref<1x128xf32, #tpu.memory_space<vmem>>) target(%163 : memref<1x128xf32, #tpu.memory_space<vmem>>) target_semaphore(%165 : memref<!tpu.dma_semaphore, #tpu.memory_space<semaphore_mem>>)
    %c7_i32_111 = arith.constant 7 : i32
    %c8_i32_112 = arith.constant 8 : i32
    %166 = arith.addi %0, %c8_i32_112 : i32
    %167 = arith.addi %166, %c7_i32_111 : i32
    %168 = arith.index_cast %167 : i32 to index
    %169 = memref.load %arg1[%168] : memref<16xi32, #tpu.memory_space<smem>>
    %c0_i32_113 = arith.constant 0 : i32
    %c63_i32_114 = arith.constant 63 : i32
    %170 = arith.maxsi %c0_i32_113, %169 : i32
    %171 = arith.minsi %c63_i32_114, %170 : i32
    %c8_i32_115 = arith.constant 8 : i32
    %172 = arith.addi %c8_i32_115, %c7_i32_111 : i32
    %c1_i32_116 = arith.constant 1 : i32
    %c0_i32_117 = arith.constant 0 : i32
    %173 = tpu.memref_slice %arg2[%171, %c0_i32_117] : memref<64x128xf32, #tpu.memory_space<vmem>> -> memref<1x128xf32, #tpu.memory_space<vmem>>
    %c0_i32_118 = arith.constant 0 : i32
    %174 = tpu.memref_slice %arg3[%172, %c0_i32_118] : memref<16x128xf32, #tpu.memory_space<vmem>> -> memref<1x128xf32, #tpu.memory_space<vmem>>
    %175 = tpu.memref_slice %arg4[%c1_i32_116] : memref<2x!tpu.dma_semaphore, #tpu.memory_space<semaphore_mem>> -> memref<1x!tpu.dma_semaphore, #tpu.memory_space<semaphore_mem>>
    %176 = tpu.memref_squeeze %175 : memref<1x!tpu.dma_semaphore, #tpu.memory_space<semaphore_mem>> -> memref<!tpu.dma_semaphore, #tpu.memory_space<semaphore_mem>>
    tpu.enqueue_dma source(%173 : memref<1x128xf32, #tpu.memory_space<vmem>>) target(%174 : memref<1x128xf32, #tpu.memory_space<vmem>>) target_semaphore(%176 : memref<!tpu.dma_semaphore, #tpu.memory_space<semaphore_mem>>)
    %c8_i32_119 = arith.constant 8 : i32
    %c0_i32_120 = arith.constant 0 : i32
    %c0_i32_121 = arith.constant 0 : i32
    %c0_i32_122 = arith.constant 0 : i32
    %177 = tpu.memref_slice %arg3[%c0_i32_121, %c0_i32_122] : memref<16x128xf32, #tpu.memory_space<vmem>> -> memref<8x128xf32, #tpu.memory_space<vmem>>
    %c0_i32_123 = arith.constant 0 : i32
    %c0_i32_124 = arith.constant 0 : i32
    %178 = tpu.memref_slice %arg3[%c0_i32_123, %c0_i32_124] : memref<16x128xf32, #tpu.memory_space<vmem>> -> memref<8x128xf32, #tpu.memory_space<vmem>>
    %179 = tpu.memref_slice %arg4[%c0_i32_120] : memref<2x!tpu.dma_semaphore, #tpu.memory_space<semaphore_mem>> -> memref<1x!tpu.dma_semaphore, #tpu.memory_space<semaphore_mem>>
    %180 = tpu.memref_squeeze %179 : memref<1x!tpu.dma_semaphore, #tpu.memory_space<semaphore_mem>> -> memref<!tpu.dma_semaphore, #tpu.memory_space<semaphore_mem>>
    tpu.wait_dma2 semaphore(%180 : memref<!tpu.dma_semaphore, #tpu.memory_space<semaphore_mem>>) src(%177 : memref<8x128xf32, #tpu.memory_space<vmem>>) dst(%178 : memref<8x128xf32, #tpu.memory_space<vmem>>)
    %c0 = arith.constant 0 : index
    %c0_125 = arith.constant 0 : index
    %181 = vector.load %arg3[%c0, %c0_125] : memref<16x128xf32, #tpu.memory_space<vmem>>, vector<8x128xf32>
    %cst = arith.constant 11.3137083 : f32
    %182 = vector.broadcast %cst : f32 to vector<8x128xf32>
    %183 = arith.mulf %181, %182 : vector<8x128xf32>
    %c0_126 = arith.constant 0 : index
    %c0_127 = arith.constant 0 : index
    %184 = vector.load %arg3[%c0_126, %c0_127] : memref<16x128xf32, #tpu.memory_space<vmem>>, vector<8x128xf32>
    tpu.vector_store %arg3[%c0_126, %c0_127], %183 {strides = array<i32>} : memref<16x128xf32, #tpu.memory_space<vmem>>, vector<8x128xf32>,
    %c1_i32_128 = arith.constant 1 : i32
    %c8_i32_129 = arith.constant 8 : i32
    %c0_i32_130 = arith.constant 0 : i32
    %185 = tpu.memref_slice %arg3[%c8_i32_129, %c0_i32_130] : memref<16x128xf32, #tpu.memory_space<vmem>> -> memref<8x128xf32, #tpu.memory_space<vmem>>
    %c8_i32_131 = arith.constant 8 : i32
    %c0_i32_132 = arith.constant 0 : i32
    %186 = tpu.memref_slice %arg3[%c8_i32_131, %c0_i32_132] : memref<16x128xf32, #tpu.memory_space<vmem>> -> memref<8x128xf32, #tpu.memory_space<vmem>>
    %187 = tpu.memref_slice %arg4[%c1_i32_128] : memref<2x!tpu.dma_semaphore, #tpu.memory_space<semaphore_mem>> -> memref<1x!tpu.dma_semaphore, #tpu.memory_space<semaphore_mem>>
    %188 = tpu.memref_squeeze %187 : memref<1x!tpu.dma_semaphore, #tpu.memory_space<semaphore_mem>> -> memref<!tpu.dma_semaphore, #tpu.memory_space<semaphore_mem>>
    tpu.wait_dma2 semaphore(%188 : memref<!tpu.dma_semaphore, #tpu.memory_space<semaphore_mem>>) src(%185 : memref<8x128xf32, #tpu.memory_space<vmem>>) dst(%186 : memref<8x128xf32, #tpu.memory_space<vmem>>)
    %c8 = arith.constant 8 : index
    %c0_133 = arith.constant 0 : index
    %189 = vector.load %arg3[%c8, %c0_133] : memref<16x128xf32, #tpu.memory_space<vmem>>, vector<8x128xf32>
    %cst_134 = arith.constant 11.3137083 : f32
    %190 = vector.broadcast %cst_134 : f32 to vector<8x128xf32>
    %191 = arith.mulf %189, %190 : vector<8x128xf32>
    %c8_135 = arith.constant 8 : index
    %c0_136 = arith.constant 0 : index
    %192 = vector.load %arg3[%c8_135, %c0_136] : memref<16x128xf32, #tpu.memory_space<vmem>>, vector<8x128xf32>
    tpu.vector_store %arg3[%c8_135, %c0_136], %191 {strides = array<i32>} : memref<16x128xf32, #tpu.memory_space<vmem>>, vector<8x128xf32>,
    return
  }
  func.func @transform_0(%arg0: i32, %arg1: memref<16xi32, #tpu.memory_space<smem>>) -> (i32, i32) {
    %c0_i32 = arith.constant 0 : i32
    %c0_i32_0 = arith.constant 0 : i32
    %c0_i32_1 = arith.constant 0 : i32
    return %c0_i32, %c0_i32_0 : i32, i32
  }
  func.func @transform_1(%arg0: i32, %arg1: memref<16xi32, #tpu.memory_space<smem>>) -> (i32, i32) {
    %c0_i32 = arith.constant 0 : i32
    %c0_i32_0 = arith.constant 0 : i32
    return %arg0, %c0_i32 : i32, i32
  }
}

</mosaic_0001>

<bundles_post_ra>
// kernel: tpu_custom_call.1
= control target key start
LH: loop header
LB: loop body
LE: loop exit
PB: predicated region body
PF: predicated region fallthrough
CT: control target
= control target key end

     0   :  { %s1352_s0 = inlined_call_operand.hbm [shape: s32[16], index: 0, kind: input, shape index: {}]   ;;  %s1353_s1 = inlined_call_operand.hbm [shape: f32[64,128], index: 1, kind: input, shape index: {}]   ;;  %s1354_s2 = inlined_call_operand.hbm [shape: f32[16,128], index: 2, kind: output, shape index: {}]  }
   0x1   :  { %s1226_s11 = scalar_lea.hbm %s1352_s0, 16 }
   0x2   :  { %p1227_p0 = scmp.ne.s32.totalorder %s1352_s0, %s1226_s11  ;;  %p1230_p1 = scmp.lt.u32.totalorder %s1226_s11, %s1352_s0 }
   0x4   :  { %p1232_p2 = pnand %p1230_p1, %p1227_p0 }
   0x6   :  { %1235 = shalt.err (!%p1232_p2)  }
   0x7   :  { %s1290_s16 = smov [#allocation4]  }
   0x8   :  { %8 = dma.hbm_to_smem %s1352_s0, 16, %s1290_s16, [#allocation3] }
   0x9   :  { %1280 = dma.done.wait [#allocation3], 16 }
   0xa   :  { %1281 = vsyncadd [#allocation3], 4294967280 }
   0xb   :  { %10 = sfence }
   0xc   :  { %11 = vsyncpa [#allocation6], 0 }
   0xd   :  { %12 = vsyncpa [#allocation7], 0  ;;  %s1291_s19 = smov [#allocation5]   ;;  %s1236_s23 = scalar_lea.hbm %s1353_s1, 1024 }
   0xe   :  { %s18_s20 = sshll.u32 %s1291_s19, 4  ;;  %p1237_p3 = scmp.ne.s32.totalorder %s1353_s1, %s1236_s23  ;;  %s19_s20 = int_to_ptr.vmem [resolvable:$true] %s18_s20 }
   0xf   :  { %p1240_p4 = scmp.lt.u32.totalorder %s1236_s23, %s1353_s1 }
  0x11   :  { %p1242_p5 = pnand %p1240_p4, %p1237_p3 }
  0x13   :  { %1245 = shalt.err (!%p1242_p5)
}
  0x14   :  { %s1246_s0 = scalar_lea.vmem %s19_s20, 1024  ;;  %p1251_p7 = scmp.lt.s32.totalorder %s19_s20, %s19_s20 }
  0x15   :  { %p1247_p6 = scmp.ne.s32.totalorder %s19_s20, %s1246_s0  ;;  %p1252_p8 = scmp.lt.s32.totalorder %s1246_s0, %s1246_s0 }
  0x17   :  { %p1253_p9 = por %p1252_p8, %p1251_p7 }
  0x19   :  { %p1254_p10 = pnand %p1253_p9, %p1247_p6 }
  0x1b   :  { %1257 = shalt.err (!%p1254_p10)
}
  0x1c   :  { %s1292_s28 = smov 128   ;;  %s1293_s29 = smov 8  }
  0x1d   :  { %24 = dma.hbm_to_vmem [thread:$0]  %s1353_s1, 1024, %s19_s20, [#allocation6], %s1292_s28, %s1292_s28, %s1293_s29  }
  0x1e   :  { %1282 = dma.done.wait [#allocation6], 1024  }
  0x1f   :  { %1283 = vsyncadd [#allocation6], 4294966272  ;;  %s29_s4 = sld [smem:[#allocation4]] }
  0x25   :  { %p30_p11 = scmp.gt.s32.totalorder %s29_s4, 0  ;;  %p1092_p12 = scmp.lt.s32.totalorder %s29_s4, 63 }
  0x27   :  { %s1356_s4 = smov (!%p30_p11, %s29_s4), 0 }
  0x28   :  { %s1358_s4 = smov (!%p1092_p12, %s1356_s4), 63 }
  0x29   :  { %s34_s5 = scalar_lea.vmem [#allocation5], %s1358_s4 }
  0x2a   :  { %v52_v0 = vld [vmem:[%s34_s5] sm:$0x1] }
  0x2b   :  { %53 = vst [vmem:[#allocation8] sm:$0x1] %v52_v0 }
  0x2c   :  { %78 = vsyncadd [#allocation2], 16  ;;  %s1097_s6 = sld [smem:[#allocation4 + $0x1]] }
  0x32   :  { %p81_p13 = scmp.gt.s32.totalorder %s1097_s6, 0  ;;  %p1098_p0 = scmp.lt.s32.totalorder %s1097_s6, 63 }
  0x34   :  { %s1360_s6 = smov (!%p81_p13, %s1097_s6), 0 }
  0x35   :  { %s1362_s6 = smov (!%p1098_p0, %s1360_s6), 63 }
  0x36   :  { %s85_s7 = scalar_lea.vmem [#allocation5], %s1362_s6 }
  0x37   :  { %v104_v1 = vld [vmem:[%s85_s7] sm:$0x1] }
  0x38   :  { %105 = vst [vmem:[#allocation8 + $0x1] sm:$0x1] %v104_v1 }
  0x39   :  { %130 = vsyncadd [#allocation2], 16  ;;  %s1103_s1 = sld [smem:[#allocation4 + $0x2]] }
  0x3f   :  { %p133_p1 = scmp.gt.s32.totalorder %s1103_s1, 0  ;;  %p1104_p2 = scmp.lt.s32.totalorder %s1103_s1, 63 }
  0x41   :  { %s1364_s1 = smov (!%p133_p1, %s1103_s1), 0 }
  0x42   :  { %s1366_s1 = smov (!%p1104_p2, %s1364_s1), 63 }
  0x43   :  { %s137_s8 = scalar_lea.vmem [#allocation5], %s1366_s1 }
  0x44   :  { %v156_v2 = vld [vmem:[%s137_s8] sm:$0x1] }
  0x45   :  { %157 = vst [vmem:[#allocation8 + $0x2] sm:$0x1] %v156_v2 }
  0x46   :  { %182 = vsyncadd [#allocation2], 16  ;;  %s1109_s9 = sld [smem:[#allocation4 + $0x3]] }
  0x4c   :  { %p185_p3 = scmp.gt.s32.totalorder %s1109_s9, 0  ;;  %p1110_p4 = scmp.lt.s32.totalorder %s1109_s9, 63 }
  0x4e   :  { %s1368_s9 = smov (!%p185_p3, %s1109_s9), 0 }
  0x4f   :  { %s1370_s9 = smov (!%p1110_p4, %s1368_s9), 63 }
  0x50   :  { %s189_s10 = scalar_lea.vmem [#allocation5], %s1370_s9 }
  0x51   :  { %v208_v3 = vld [vmem:[%s189_s10] sm:$0x1] }
  0x52   :  { %209 = vst [vmem:[#allocation8 + $0x3] sm:$0x1] %v208_v3 }
  0x53   :  { %234 = vsyncadd [#allocation2], 16  ;;  %s1115_s11 = sld [smem:[#allocation4 + $0x4]] }
  0x59   :  { %p237_p5 = scmp.gt.s32.totalorder %s1115_s11, 0  ;;  %p1116_p6 = scmp.lt.s32.totalorder %s1115_s11, 63 }
  0x5b   :  { %s1372_s11 = smov (!%p237_p5, %s1115_s11), 0 }
  0x5c   :  { %s1374_s11 = smov (!%p1116_p6, %s1372_s11), 63 }
  0x5d   :  { %s241_s12 = scalar_lea.vmem [#allocation5], %s1374_s11 }
  0x5e   :  { %v260_v4 = vld [vmem:[%s241_s12] sm:$0x1] }
  0x5f   :  { %261 = vst [vmem:[#allocation8 + $0x4] sm:$0x1] %v260_v4 }
  0x60   :  { %286 = vsyncadd [#allocation2], 16  ;;  %s1121_s13 = sld [smem:[#allocation4 + $0x5]] }
  0x66   :  { %p289_p7 = scmp.gt.s32.totalorder %s1121_s13, 0  ;;  %p1122_p8 = scmp.lt.s32.totalorder %s1121_s13, 63 }
  0x68   :  { %s1376_s13 = smov (!%p289_p7, %s1121_s13), 0 }
  0x69   :  { %s1378_s13 = smov (!%p1122_p8, %s1376_s13), 63 }
  0x6a   :  { %s293_s14 = scalar_lea.vmem [#allocation5], %s1378_s13 }
  0x6b   :  { %v312_v5 = vld [vmem:[%s293_s14] sm:$0x1] }
  0x6c   :  { %313 = vst [vmem:[#allocation8 + $0x5] sm:$0x1] %v312_v5 }
  0x6d   :  { %338 = vsyncadd [#allocation2], 16  ;;  %s1127_s15 = sld [smem:[#allocation4 + $0x6]] }
  0x73   :  { %p341_p9 = scmp.gt.s32.totalorder %s1127_s15, 0  ;;  %p1128_p10 = scmp.lt.s32.totalorder %s1127_s15, 63 }
  0x75   :  { %s1380_s15 = smov (!%p341_p9, %s1127_s15), 0 }
  0x76   :  { %s1382_s15 = smov (!%p1128_p10, %s1380_s15), 63 }
  0x77   :  { %s345_s16 = scalar_lea.vmem [#allocation5], %s1382_s15 }
  0x78   :  { %v364_v6 = vld [vmem:[%s345_s16] sm:$0x1] }
  0x79   :  { %365 = vst [vmem:[#allocation8 + $0x6] sm:$0x1] %v364_v6 }
  0x7a   :  { %390 = vsyncadd [#allocation2], 16  ;;  %s1133_s17 = sld [smem:[#allocation4 + $0x7]] }
  0x80   :  { %p393_p11 = scmp.gt.s32.totalorder %s1133_s17, 0  ;;  %p1134_p12 = scmp.lt.s32.totalorder %s1133_s17, 63 }
  0x82   :  { %s1384_s17 = smov (!%p393_p11, %s1133_s17), 0 }
  0x83   :  { %s1386_s17 = smov (!%p1134_p12, %s1384_s17), 63 }
  0x84   :  { %s397_s18 = scalar_lea.vmem [#allocation5], %s1386_s17 }
  0x85   :  { %v416_v7 = vld [vmem:[%s397_s18] sm:$0x1] }
  0x86   :  { %417 = vst [vmem:[#allocation8 + $0x7] sm:$0x1] %v416_v7 }
  0x87   :  { %442 = vsyncadd [#allocation2], 16  ;;  %s1139_s19 = sld [smem:[#allocation4 + $0x8]] }
  0x8d   :  { %p445_p13 = scmp.gt.s32.totalorder %s1139_s19, 0  ;;  %p1140_p0 = scmp.lt.s32.totalorder %s1139_s19, 63 }
  0x8f   :  { %s1388_s19 = smov (!%p445_p13, %s1139_s19), 0 }
  0x90   :  { %s1390_s19 = smov (!%p1140_p0, %s1388_s19), 63 }
  0x91   :  { %s449_s20 = scalar_lea.vmem [#allocation5], %s1390_s19 }
  0x92   :  { %v469_v8 = vld [vmem:[%s449_s20] sm:$0x1] }
  0x93   :  { %470 = vst [vmem:[#allocation8 + $0x8] sm:$0x1] %v469_v8 }
  0x94   :  { %495 = vsyncadd [#allocation2 + $0x1], 16  ;;  %s1145_s21 = sld [smem:[#allocation4 + $0x9]] }
  0x9a   :  { %p498_p1 = scmp.gt.s32.totalorder %s1145_s21, 0  ;;  %p1146_p2 = scmp.lt.s32.totalorder %s1145_s21, 63 }
  0x9c   :  { %s1392_s21 = smov (!%p498_p1, %s1145_s21), 0 }
  0x9d   :  { %s1394_s21 = smov (!%p1146_p2, %s1392_s21), 63 }
  0x9e   :  { %s502_s22 = scalar_lea.vmem [#allocation5], %s1394_s21 }
  0x9f   :  { %v521_v9 = vld [vmem:[%s502_s22] sm:$0x1] }
  0xa0   :  { %522 = vst [vmem:[#allocation8 + $0x9] sm:$0x1] %v521_v9 }
  0xa1   :  { %547 = vsyncadd [#allocation2 + $0x1], 16  ;;  %s1151_s23 = sld [smem:[#allocation4 + $0xa]] }
  0xa7   :  { %p550_p3 = scmp.gt.s32.totalorder %s1151_s23, 0  ;;  %p1152_p4 = scmp.lt.s32.totalorder %s1151_s23, 63 }
  0xa9   :  { %s1396_s23 = smov (!%p550_p3, %s1151_s23), 0 }
  0xaa   :  { %s1398_s23 = smov (!%p1152_p4, %s1396_s23), 63 }
  0xab   :  { %s554_s24 = scalar_lea.vmem [#allocation5], %s1398_s23 }
  0xac   :  { %v573_v10 = vld [vmem:[%s554_s24] sm:$0x1] }
  0xad   :  { %574 = vst [vmem:[#allocation8 + $0xa] sm:$0x1] %v573_v10 }
  0xae   :  { %599 = vsyncadd [#allocation2 + $0x1], 16  ;;  %s1157_s25 = sld [smem:[#allocation4 + $0xb]] }
  0xb4   :  { %p602_p5 = scmp.gt.s32.totalorder %s1157_s25, 0  ;;  %p1158_p6 = scmp.lt.s32.totalorder %s1157_s25, 63 }
  0xb6   :  { %s1400_s25 = smov (!%p602_p5, %s1157_s25), 0 }
  0xb7   :  { %s1402_s25 = smov (!%p1158_p6, %s1400_s25), 63 }
  0xb8   :  { %s606_s26 = scalar_lea.vmem [#allocation5], %s1402_s25 }
  0xb9   :  { %v625_v11 = vld [vmem:[%s606_s26] sm:$0x1] }
  0xba   :  { %626 = vst [vmem:[#allocation8 + $0xb] sm:$0x1] %v625_v11 }
  0xbb   :  { %651 = vsyncadd [#allocation2 + $0x1], 16  ;;  %s1163_s27 = sld [smem:[#allocation4 + $0xc]] }
  0xc1   :  { %p654_p7 = scmp.gt.s32.totalorder %s1163_s27, 0  ;;  %p1164_p8 = scmp.lt.s32.totalorder %s1163_s27, 63 }
  0xc3   :  { %s1404_s27 = smov (!%p654_p7, %s1163_s27), 0 }
  0xc4   :  { %s1406_s27 = smov (!%p1164_p8, %s1404_s27), 63 }
  0xc5   :  { %s658_s0 = scalar_lea.vmem [#allocation5], %s1406_s27 }
  0xc6   :  { %v677_v12 = vld [vmem:[%s658_s0] sm:$0x1] }
  0xc7   :  { %678 = vst [vmem:[#allocation8 + $0xc] sm:$0x1] %v677_v12 }
  0xc8   :  { %703 = vsyncadd [#allocation2 + $0x1], 16  ;;  %s1169_s30 = sld [smem:[#allocation4 + $0xd]] }
  0xce   :  { %p706_p9 = scmp.gt.s32.totalorder %s1169_s30, 0  ;;  %p1170_p10 = scmp.lt.s32.totalorder %s1169_s30, 63 }
  0xd0   :  { %s1408_s30 = smov (!%p706_p9, %s1169_s30), 0 }
  0xd1   :  { %s1410_s30 = smov (!%p1170_p10, %s1408_s30), 63 }
  0xd2   :  { %s710_s3 = scalar_lea.vmem [#allocation5], %s1410_s30 }
  0xd3   :  { %v729_v13 = vld [vmem:[%s710_s3] sm:$0x1] }
  0xd4   :  { %730 = vst [vmem:[#allocation8 + $0xd] sm:$0x1] %v729_v13 }
  0xd5   :  { %755 = vsyncadd [#allocation2 + $0x1], 16  ;;  %s1175_s4 = sld [smem:[#allocation4 + $0xe]] }
  0xdb   :  { %p758_p11 = scmp.gt.s32.totalorder %s1175_s4, 0  ;;  %p1176_p12 = scmp.lt.s32.totalorder %s1175_s4, 63 }
  0xdd   :  { %s1412_s4 = smov (!%p758_p11, %s1175_s4), 0 }
  0xde   :  { %s1414_s4 = smov (!%p1176_p12, %s1412_s4), 63 }
  0xdf   :  { %s762_s5 = scalar_lea.vmem [#allocation5], %s1414_s4 }
  0xe0   :  { %v781_v14 = vld [vmem:[%s762_s5] sm:$0x1] }
  0xe1   :  { %782 = vst [vmem:[#allocation8 + $0xe] sm:$0x1] %v781_v14 }
  0xe2   :  { %807 = vsyncadd [#allocation2 + $0x1], 16  ;;  %s1181_s6 = sld [smem:[#allocation4 + $0xf]] }
  0xe8   :  { %p810_p13 = scmp.gt.s32.totalorder %s1181_s6, 0  ;;  %p1182_p0 = scmp.lt.s32.totalorder %s1181_s6, 63 }
  0xea   :  { %s1416_s6 = smov (!%p810_p13, %s1181_s6), 0 }
  0xeb   :  { %s1418_s6 = smov (!%p1182_p0, %s1416_s6), 63 }
  0xec   :  { %s814_s7 = scalar_lea.vmem [#allocation5], %s1418_s6 }
  0xed   :  { %v833_v15 = vld [vmem:[%s814_s7] sm:$0x1] }
  0xee   :  { %834 = vst [vmem:[#allocation8 + $0xf] sm:$0x1] %v833_v15 }
  0xef   :  { %859 = vsyncadd [#allocation2 + $0x1], 16 }
  0xf0   :  { %1284 = dma.done.wait [#allocation2], 128 }
  0xf1   :  { %1285 = vsyncadd [#allocation2], 4294967168  ;;  %v863_v16 = vld [vmem:[#allocation8] sm:$0xff] }
  0xf2   :  { %v864_v17 = vmul.f32 11.313708, %v863_v16 }
  0xf4   :  { %865 = vst [vmem:[#allocation8] sm:$0xff] %v864_v17 }
  0xf5   :  { %1286 = dma.done.wait [#allocation2 + $0x1], 128 }
  0xf6   :  { %1287 = vsyncadd [#allocation2 + $0x1], 4294967168  ;;  %s1294_s1 = smov [#allocation8]   ;;  %v868_v18 = vld [vmem:[#allocation8 + $0x8] sm:$0xff] }
  0xf7   :  { %s876_s8 = sshll.u32 %s1294_s1, 4  ;;  %v869_v19 = vmul.f32 11.313708, %v868_v18  ;;  %s877_s8 = int_to_ptr.vmem [resolvable:$true] %s876_s8 }
  0xf8   :  { %s1258_s9 = scalar_lea.vmem %s877_s8, 256  ;;  %p1263_p2 = scmp.lt.s32.totalorder %s877_s8, %s877_s8 }
  0xf9   :  { %870 = vst [vmem:[#allocation8 + $0x8] sm:$0xff] %v869_v19  ;;  %p1259_p1 = scmp.ne.s32.totalorder %s877_s8, %s1258_s9  ;;  %p1264_p3 = scmp.lt.s32.totalorder %s1258_s9, %s1258_s9 }
  0xfb   :  { %p1265_p4 = por %p1264_p3, %p1263_p2 }
  0xfd   :  { %p1266_p5 = pnand %p1265_p4, %p1259_p1 }
  0xff   :  { %1269 = shalt.err (!%p1266_p5)
}
 0x100   :  { %s1270_s12 = scalar_lea.hbm %s1354_s2, 256 }
 0x101   :  { %p1271_p6 = scmp.ne.s32.totalorder %s1354_s2, %s1270_s12  ;;  %p1274_p7 = scmp.lt.u32.totalorder %s1270_s12, %s1354_s2 }
 0x103   :  { %p1276_p8 = pnand %p1274_p7, %p1271_p6 }
 0x105   :  { %1279 = shalt.err (!%p1276_p8)
}
 0x106   :  { %882 = dma.vmem_to_hbm [thread:$0]  %s877_s8, 256, %s1354_s2, [#allocation7], %s1292_s28, %s1292_s28, %s1293_s29  }
 0x107   :  { %1288 = dma.done.wait [#allocation7], 256  }
 0x108   :  { %1289 = vsyncadd [#allocation7], 4294967040 }
 0x109   :  { %886 = vsyncpa [#allocation6], 1 }
 0x10a   :  { %887 = vsyncpa [#allocation7], 1 }
 0x10b   :  { %888 = vsyncmov [#allocation2] }
 0x10e   :  { %s889_s19 = vpop.sfrf %888 }
 0x10f   :  { %p1187_p9 = scmp.ne.s32.totalorder %s889_s19, 0 }
 0x111   :  { %893 = shalt.err (%p1187_p9)  }
 0x112   :  { %895 = vsyncmov [#allocation2 + $0x1] }
 0x115   :  { %s896_s20 = vpop.sfrf %895 }
 0x116   :  { %p1188_p10 = scmp.ne.s32.totalorder %s896_s20, 0 }
 0x118   :  { %900 = shalt.err (%p1188_p10)  }

</bundles_post_ra>
